<compile_context>
chip_gen: v7x
topology: tpu7x:2x2x1
jax: 0.10.0
libtpu: 0.0.40
codegen_flags: <defaults>
</compile_context>

<pallas_src>
import functools

import jax
import jax.numpy as jnp
from jax import lax
from jax.experimental import pallas as pl
from jax.experimental.pallas import tpu as pltpu


# ---------------------------------------------------------------------------
# helpers
# ---------------------------------------------------------------------------
def _round_up(n, m):
    return ((n + m - 1) // m) * m


def _largest_divisor_leq(n, cap):
    cap = max(1, min(cap, n))
    for t in range(cap, 0, -1):
        if n % t == 0:
            return t
    return 1


def _pick_row_tile(m, cap=1024):
    """Largest row tile <= cap that divides m and is 8-aligned (or full m)."""
    if m <= cap or m % 8 != 0:
        return m
    t = cap - (cap % 8)
    while m % t != 0:
        t -= 8
    return t


# ---------------------------------------------------------------------------
# 1) Input projection: (seq_len*batch_p, input) @ (input, hidden_p) + (bi + bh)
# ---------------------------------------------------------------------------
def _proj_kernel(x_ref, w_ref, b_ref, o_ref):
    o_ref[...] = (jnp.dot(x_ref[...], w_ref[...],
                          preferred_element_type=jnp.float32)
                  + b_ref[...]).astype(o_ref.dtype)


def _input_projection(x, wi, bias, out_dtype):
    seq_len, batch, input_size = x.shape
    hidden = wi.shape[1]
    m = seq_len * batch
    mt = _pick_row_tile(m)
    x2 = x.reshape(m, input_size)
    bias2 = bias.reshape(1, hidden).astype(jnp.float32)

    out_itemsize = jnp.dtype(out_dtype).itemsize
    cost = pl.CostEstimate(
        flops=2 * m * input_size * hidden,
        transcendentals=0,
        bytes_accessed=(m * input_size * x.dtype.itemsize
                        + input_size * hidden * wi.dtype.itemsize
                        + hidden * 4
                        + m * hidden * out_itemsize),
    )

    out = pl.pallas_call(
        _proj_kernel,
        out_shape=jax.ShapeDtypeStruct((m, hidden), out_dtype),
        grid_spec=pltpu.PrefetchScalarGridSpec(
            num_scalar_prefetch=0,
            grid=(m // mt,),
            in_specs=[
                pl.BlockSpec((mt, input_size), lambda i: (i, 0)),
                # Grid-invariant weights / bias: one full VMEM copy,
                # no double buffering.
                pl.BlockSpec(memory_space=pltpu.MemorySpace.VMEM),
                pl.BlockSpec(memory_space=pltpu.MemorySpace.VMEM),
            ],
            out_specs=pl.BlockSpec((mt, hidden), lambda i: (i, 0)),
        ),
        compiler_params=pltpu.CompilerParams(
            dimension_semantics=("parallel",)),
        cost_estimate=cost,
    )(x2, wi, bias2)
    return out.reshape(seq_len, batch, hidden)


# ---------------------------------------------------------------------------
# 2) Serial recurrence over time, t_block timesteps per grid step
# ---------------------------------------------------------------------------
def _recurrence_kernel(xp_ref, wh_ref, h0_ref, out_ref, hlast_ref, h_scratch,
                       *, alpha, oneminusalpha, t_block, unroll):
    t = pl.program_id(1)  # sequential time-block axis

    @pl.when(t == 0)
    def _():
        h_scratch[...] = h0_ref[...].astype(jnp.float32)

    mx_dtype = wh_ref.dtype  # bf16 on v6e/v7x path, f32 otherwise

    def step(i, h):
        # Input projection (incl. both biases) was precomputed; only the
        # h @ Wh matmul + leaky integration remains on the serial path.
        # Wh is read from VMEM inside the body rather than pinned in vregs
        # across the unrolled loop (avoids register-file spill at hidden>128).
        pre = xp_ref[i].astype(jnp.float32) + jnp.dot(
            h.astype(mx_dtype), wh_ref[...],
            preferred_element_type=jnp.float32)
        # Elementwise leaky integration stays in f32 (no bf16 VPU penalty).
        h_new = oneminusalpha * h + alpha * jnp.maximum(pre, 0.0)
        out_ref[i] = h_new.astype(out_ref.dtype)
        return h_new

    h_final = lax.fori_loop(0, t_block, step, h_scratch[...], unroll=unroll)
    h_scratch[...] = h_final
    hlast_ref[...] = h_final  # exact f32 final state (not a rounded out[-1])


def ctrnn_forward(x, wi, bi, wh, bh, h0=None, *, alpha, time_block=32,
                  batch_block=None, matmul_dtype=None, vmem_limit_bytes=None):
    """CTRNN forward pass.

    x:  (seq_len, batch, input_size)
    wi: (input_size, hidden)   bi: (hidden,)
    wh: (hidden, hidden)       bh: (hidden,)
    h0: (batch, hidden) or None (zeros, matching the PyTorch module)
    Returns (output, hidden_final), output: (seq_len, batch, hidden).
    """
    seq_len, batch, input_size = x.shape
    hidden = wi.shape[1]
    out_dtype = x.dtype

    matmul_dtype = jnp.dtype(jnp.float32 if matmul_dtype is None else matmul_dtype)

    if h0 is None:
        h0 = jnp.zeros((batch, hidden), dtype=jnp.float32)

    # -- Pad to hardware-friendly shapes: batch -> 8 sublanes, hidden -> 128 lanes.
    batch_p = _round_up(batch, 8)
    hidden_p = _round_up(hidden, 128)

    if batch_p != batch:
        x = jnp.pad(x, ((0, 0), (0, batch_p - batch), (0, 0)))
        h0 = jnp.pad(h0, ((0, batch_p - batch), (0, 0)))
    bias = bi + bh
    if hidden_p != hidden:
        wi = jnp.pad(wi, ((0, 0), (0, hidden_p - hidden)))
        wh = jnp.pad(wh, ((0, hidden_p - hidden), (0, hidden_p - hidden)))
        bias = jnp.pad(bias, (0, hidden_p - hidden))
        h0 = jnp.pad(h0, ((0, 0), (0, hidden_p - hidden)))

    wh_mx = wh.astype(matmul_dtype)

    # 1) Hoisted non-serial work: one big GEMM, biases fused in.
    x_proj = _input_projection(x, wi, bias, out_dtype=matmul_dtype)  # (S,Bp,Hp)

    # 2) Tiling for the serial recurrence.
    t_blk = _largest_divisor_leq(seq_len, time_block)
    n_t = seq_len // t_blk
    unroll = min(8, t_blk)  # cap unroll; amortize grid overhead via t_blk

    if batch_block is None:
        # Default: let the "parallel" batch axis actually exercise 2 TCs (v7x)
        # when the batch is big enough; no-op on single-TC v5e/v6e.
        if batch_p >= 16 and (batch_p // 2) % 8 == 0:
            b_blk = batch_p // 2
        else:
            b_blk = batch_p
    else:
        if (batch_p % batch_block != 0
                or (batch_block % 8 != 0 and batch_block != batch_p)):
            raise ValueError(
                "batch_block must divide the padded batch and be a multiple "
                "of 8 (or equal the full padded batch)")
        b_blk = batch_block
    n_b = batch_p // b_blk

    mx_itemsize = matmul_dtype.itemsize
    out_itemsize = jnp.dtype(out_dtype).itemsize

    cost = pl.CostEstimate(
        flops=2 * seq_len * batch_p * hidden_p * hidden_p,
        transcendentals=0,
        bytes_accessed=(seq_len * batch_p * hidden_p * mx_itemsize    # x_proj
                        + hidden_p * hidden_p * mx_itemsize           # Wh
                        + batch_p * hidden_p * 4                      # h0
                        + seq_len * batch_p * hidden_p * out_itemsize # out
                        + batch_p * hidden_p * 4),                    # h_last
    )

    # VMEM budget: single-copy Wh + double-buffered x_proj/out blocks + scratch.
    wh_bytes = hidden_p * hidden_p * mx_itemsize
    xp_blk_bytes = t_blk * b_blk * hidden_p * mx_itemsize
    out_blk_bytes = t_blk * b_blk * hidden_p * out_itemsize
    small_bytes = b_blk * hidden_p * 4
    budget = (wh_bytes + 2 * (xp_blk_bytes + out_blk_bytes)
              + 4 * small_bytes + small_bytes + (2 << 20))
    if vmem_limit_bytes is None and budget > (32 << 20):
        vmem_limit_bytes = budget  # raise default scoped limit (v7x / big H)

    cp_kwargs = dict(dimension_semantics=("parallel", "arbitrary"))
    if vmem_limit_bytes is not None:
        cp_kwargs["vmem_limit_bytes"] = int(vmem_limit_bytes)

    kernel = functools.partial(
        _recurrence_kernel,
        alpha=float(alpha),
        oneminusalpha=float(1.0 - alpha),
        t_block=t_blk,
        unroll=unroll,
    )

    out_p, h_last_p = pl.pallas_call(
        kernel,
        out_shape=(
            jax.ShapeDtypeStruct((seq_len, batch_p, hidden_p), out_dtype),
            jax.ShapeDtypeStruct((batch_p, hidden_p), jnp.float32),
        ),
        grid_spec=pltpu.PrefetchScalarGridSpec(
            num_scalar_prefetch=0,
            grid=(n_b, n_t),            # (parallel batch blocks, serial time)
            in_specs=[
                pl.BlockSpec((t_blk, b_blk, hidden_p), lambda b, t: (t, b, 0)),
                # Wh is grid-invariant: one VMEM-resident copy, no double buffer.
                pl.BlockSpec(memory_space=pltpu.MemorySpace.VMEM),
                pl.BlockSpec((b_blk, hidden_p), lambda b, t: (b, 0)),
            ],
            out_specs=(
                pl.BlockSpec((t_blk, b_blk, hidden_p), lambda b, t: (t, b, 0)),
                pl.BlockSpec((b_blk, hidden_p), lambda b, t: (b, 0)),
            ),
            scratch_shapes=[pltpu.VMEM((b_blk, hidden_p), jnp.float32)],
        ),
        compiler_params=pltpu.CompilerParams(**cp_kwargs),
        cost_estimate=cost,
    )(x_proj, wh_mx, h0)

    out = out_p[:, :batch, :hidden]
    h_last = h_last_p[:batch, :hidden].astype(out_dtype)
    return out, h_last


# ---------------------------------------------------------------------------
# Pure-JAX reference matching the PyTorch module semantics
# ---------------------------------------------------------------------------
def ctrnn_reference(x, wi, bi, wh, bh, h0, *, alpha):
    oneminusalpha = 1.0 - alpha

    def step(h, x_t):
        pre = x_t @ wi + bi + h @ wh + bh
        h_new = oneminusalpha * h + alpha * jnp.maximum(pre, 0.0)
        return h_new, h_new

    h_last, out = lax.scan(step, h0, x)
    return out, h_last


if __name__ == "__main__":
    # Small, module-consistent shapes (hidden lane-aligned = 128; batch=2 gets
    # padded to 8 sublanes inside the wrapper).
    seq_len, batch, input_size, hidden_size = 16, 2, 4, 128
    tau, dt = 100.0, 20.0
    alpha = dt / tau  # matches CTRNN.__init__ when dt is given

    key = jax.random.PRNGKey(0)
    kx, kwi, kbi, kwh, kbh = jax.random.split(key, 5)

    x = jax.random.normal(kx, (seq_len, batch, input_size), dtype=jnp.float32)

    bound_i = 1.0 / (input_size ** 0.5)
    bound_h = 1.0 / (hidden_size ** 0.5)
    wi = jax.random.uniform(kwi, (input_size, hidden_size), jnp.float32,
                            -bound_i, bound_i)
    bi = jax.random.uniform(kbi, (hidden_size,), jnp.float32, -bound_i, bound_i)
    wh = jax.random.uniform(kwh, (hidden_size, hidden_size), jnp.float32,
                            -bound_h, bound_h)
    bh = jax.random.uniform(kbh, (hidden_size,), jnp.float32, -bound_h, bound_h)

    # hidden=None path of the PyTorch module: zeros initial hidden state.
    h0 = jnp.zeros((batch, hidden_size), dtype=jnp.float32)

    ref_out, ref_h = ctrnn_reference(x, wi, bi, wh, bh, h0, alpha=alpha)

    # Default f32 MXU path (safe on all generations; tight tolerance).
    out, h_last = ctrnn_forward(x, wi, bi, wh, bh, h0, alpha=alpha)
    out = jax.block_until_ready(out)
    h_last = jax.block_until_ready(h_last)
    assert out.shape == (seq_len, batch, hidden_size)
    assert h_last.shape == (batch, hidden_size)
    assert jnp.allclose(out, ref_out, atol=2e-5, rtol=2e-5)
    assert jnp.allclose(h_last, ref_h, atol=2e-5, rtol=2e-5)

    # bf16 MXU-operand path (v6e/v7x-oriented): Wh + x_proj stream in bf16,
    # hidden state and leaky integration kept in f32.
    out_bf, h_bf = ctrnn_forward(x, wi, bi, wh, bh, h0, alpha=alpha,
                                 matmul_dtype=jnp.bfloat16)
    out_bf = jax.block_until_ready(out_bf)
    h_bf = jax.block_until_ready(h_bf)
    assert jnp.allclose(out_bf, ref_out, atol=5e-2, rtol=5e-2)
    assert jnp.allclose(h_bf, ref_h, atol=5e-2, rtol=5e-2)

    print("KERNEL_OK")
</pallas_src>

<mosaic_0001>
module attributes {stable_mosaic.version = 11 : i64} {
  func.func @_proj_kernel(%arg0: i32, %arg1: memref<128x4xf32, #tpu.memory_space<vmem>>, %arg2: memref<4x128xf32, #tpu.memory_space<vmem>>, %arg3: memref<1x128xf32, #tpu.memory_space<vmem>>, %arg4: memref<128x128xf32, #tpu.memory_space<vmem>>) attributes {dimension_semantics = [#tpu.dimension_semantics<parallel>], iteration_bounds = array<i64: 1>, scalar_prefetch = 0 : i64, scratch_operands = 0 : i64, tpu.core_type = #tpu.core_type<tc>, window_params = [{transform_indices = @transform_0, window_bounds = array<i64: 128, 4>}, {pipeline_mode = #tpu.pipeline_mode<synchronous>, transform_indices = @transform_1, window_bounds = array<i64: 4, 128>}, {pipeline_mode = #tpu.pipeline_mode<synchronous>, transform_indices = @transform_2, window_bounds = array<i64: 1, 128>}, {transform_indices = @transform_3, window_bounds = array<i64: 128, 128>}]} {
    %c0 = arith.constant 0 : index
    %c0_0 = arith.constant 0 : index
    %0 = vector.load %arg1[%c0, %c0_0] : memref<128x4xf32, #tpu.memory_space<vmem>>, vector<128x4xf32>
    %c0_1 = arith.constant 0 : index
    %c0_2 = arith.constant 0 : index
    %1 = vector.load %arg2[%c0_1, %c0_2] : memref<4x128xf32, #tpu.memory_space<vmem>>, vector<4x128xf32>
    %cst = arith.constant dense<0.000000e+00> : vector<128x128xf32>
    %2 = tpu.matmul %0, %1, %cst {dimension_numbers = #tpu.dot_dimension_numbers<[1], [0], [0], [1], [0, 0, 1, 1], [], []>} : vector<128x4xf32>, vector<4x128xf32>, vector<128x128xf32> -> vector<128x128xf32>
    %c0_3 = arith.constant 0 : index
    %c0_4 = arith.constant 0 : index
    %3 = vector.load %arg3[%c0_3, %c0_4] : memref<1x128xf32, #tpu.memory_space<vmem>>, vector<1x128xf32>
    %4 = vector.broadcast %3 : vector<1x128xf32> to vector<128x128xf32>
    %5 = arith.addf %2, %4 : vector<128x128xf32>
    %c0_5 = arith.constant 0 : index
    %c0_6 = arith.constant 0 : index
    %6 = vector.load %arg4[%c0_5, %c0_6] : memref<128x128xf32, #tpu.memory_space<vmem>>, vector<128x128xf32>
    tpu.vector_store %arg4[%c0_5, %c0_6], %5 {strides = array<i32>} : memref<128x128xf32, #tpu.memory_space<vmem>>, vector<128x128xf32>,
    return
  }
  func.func @transform_0(%arg0: i32) -> (i32, i32) {
    %c0_i32 = arith.constant 0 : i32
    %c0_i32_0 = arith.constant 0 : i32
    return %arg0, %c0_i32 : i32, i32
  }
  func.func @transform_1(%arg0: i32) -> (i32, i32) {
    %c0_i32 = arith.constant 0 : i32
    %c0_i32_0 = arith.constant 0 : i32
    %c0_i32_1 = arith.constant 0 : i32
    return %c0_i32, %c0_i32_0 : i32, i32
  }
  func.func @transform_2(%arg0: i32) -> (i32, i32) {
    %c0_i32 = arith.constant 0 : i32
    %c0_i32_0 = arith.constant 0 : i32
    %c0_i32_1 = arith.constant 0 : i32
    return %c0_i32, %c0_i32_0 : i32, i32
  }
  func.func @transform_3(%arg0: i32) -> (i32, i32) {
    %c0_i32 = arith.constant 0 : i32
    %c0_i32_0 = arith.constant 0 : i32
    return %arg0, %c0_i32 : i32, i32
  }
}

</mosaic_0001>

<bundles_post_ra>
// kernel: tpu_custom_call.1
= control target key start
LH: loop header
LB: loop body
LE: loop exit
PB: predicated region body
PF: predicated region fallthrough
CT: control target
= control target key end

     0   :  { %vm88_vm0 = vcmask 1043456   ;;  %vm39_vm1 = vcmask 31744   ;;  %s464_s0 = inlined_call_operand.vmem [shape: f32[128,4], index: 0, kind: input, shape index: {}]   ;;  %s465_s1 = inlined_call_operand.vmem [shape: f32[4,128], index: 1, kind: input, shape index: {}]   ;;  %s466_s2 = inlined_call_operand.vmem [shape: f32[1,128], index: 2, kind: input, shape index: {}]   ;;  %s467_s3 = inlined_call_operand.hbm [shape: f32[128,128], index: 3, kind: output, shape index: {}]  }
   0x1   :  { %v31_v0 = vld [vmem:[%s465_s1] sm:$0xf]  ;;  %v16_v3 = vld [vmem:[%s464_s0 + $0x8] sm:$0xff]  ;;  %v17_v5 = vld [vmem:[%s464_s0 + $0x10] sm:$0xff] }
   0x2   :  { %v15_v1 = vld [vmem:[%s464_s0] sm:$0xff]  ;;  %304 = vmatprep.subr.msk.mxu0 %vm88_vm0, %v31_v0  ;;  %330 = vmatprep.subr.msk.mxu1 %vm88_vm0, %v31_v0  ;;  %v24_v4 = vld [vmem:[%s464_s0 + $0x48] sm:$0xff]  ;;  %v25_v6 = vld [vmem:[%s464_s0 + $0x50] sm:$0xff] }
   0x3   :  { %v23_v2 = vld [vmem:[%s464_s0 + $0x40] sm:$0xff]  ;;  %305 = vmatpush3.msk.msra.mxu0 %vm88_vm0, %v31_v0  ;;  %331 = vmatpush3.msk.msra.mxu1 %vm88_vm0, %v31_v0  ;;  %v18_v7 = vld [vmem:[%s464_s0 + $0x18] sm:$0xff] }
   0x4   :  { %306 = vmatprep.mubr.msk.f32.mxu0 %vm39_vm1, %v15_v1  ;;  %318 = vmatprep.mubr.msk.f32.mxu1 %vm39_vm1, %v23_v2  ;;  %v26_v8 = vld [vmem:[%s464_s0 + $0x58] sm:$0xff] }
   0x5   :  { %307 = vmatmul.mubr.msk.f32.vlgmr.msra.gmra.mrb[0].mxu0 %vm39_vm1, %v16_v3  ;;  %319 = vmatmul.mubr.msk.f32.vlgmr.msra.gmra.mrb[0].mxu1 %vm39_vm1, %v24_v4 }
   0x6   :  { %309 = vmatprep.mubr.msk.f32.mxu0 %vm39_vm1, %v17_v5  ;;  %321 = vmatprep.mubr.msk.f32.mxu1 %vm39_vm1, %v25_v6 }
   0x7   :  { %8 = vsyncpa [#allocation3], 0  ;;  %v19_v9 = vld [vmem:[%s464_s0 + $0x20] sm:$0xff]  ;;  %v20_v11 = vld [vmem:[%s464_s0 + $0x28] sm:$0xff] }
   0x8   :  { %v27_v10 = vld [vmem:[%s464_s0 + $0x60] sm:$0xff]  ;;  %v28_v12 = vld [vmem:[%s464_s0 + $0x68] sm:$0xff]  ;;  %v21_v13 = vld [vmem:[%s464_s0 + $0x30] sm:$0xff] }
   0x9   :  { %310 = vmatmul.mubr.msk.f32.gmra.mrb[2].mxu0 %vm39_vm1, %v18_v7  ;;  %322 = vmatmul.mubr.msk.f32.gmra.mrb[2].mxu1 %vm39_vm1, %v26_v8  ;;  %v29_v14 = vld [vmem:[%s464_s0 + $0x70] sm:$0xff]  ;;  %v22_v15 = vld [vmem:[%s464_s0 + $0x38] sm:$0xff]  ;;  %v269_v17 = vld [vmem:[%s466_s2] ss:$0 sm:$0xff] }
   0xa   :  { %312 = vmatprep.mubr.msk.f32.mxu0 %vm39_vm1, %v19_v9  ;;  %324 = vmatprep.mubr.msk.f32.mxu1 %vm39_vm1, %v27_v10  ;;  %v30_v16 = vld [vmem:[%s464_s0 + $0x78] sm:$0xff]  ;;  %s359_s0 = smov [#allocation2]  }
   0xb   :  { %s258_s2 = sshll.u32 %s359_s0, 4  ;;  %s259_s2 = int_to_ptr.vmem [resolvable:$true] %s258_s2 }
   0xc   :  { %s335_s20 = scalar_lea.vmem %s259_s2, 2048  ;;  %p340_p1 = scmp.lt.s32.totalorder %s259_s2, %s259_s2 }
   0xd   :  { %313 = vmatmul.mubr.msk.f32.gmra.mrb[4].mxu0 %vm39_vm1, %v20_v11  ;;  %325 = vmatmul.mubr.msk.f32.gmra.mrb[4].mxu1 %vm39_vm1, %v28_v12  ;;  %p336_p0 = scmp.ne.s32.totalorder %s259_s2, %s335_s20  ;;  %p341_p2 = scmp.lt.s32.totalorder %s335_s20, %s335_s20 }
   0xe   :  { %315 = vmatprep.mubr.msk.f32.mxu0 %vm39_vm1, %v21_v13  ;;  %327 = vmatprep.mubr.msk.f32.mxu1 %vm39_vm1, %v29_v14 }
   0xf   :  { %p342_p3 = por %p341_p2, %p340_p1 }
  0x11   :  { %316 = vmatmul.mubr.msk.f32.gmra.mrb[6].mxu0 %vm39_vm1, %v22_v15  ;;  %328 = vmatmul.mubr.msk.f32.gmra.mrb[6].mxu1 %vm39_vm1, %v30_v16  ;;  %p343_p4 = pnand %p342_p3, %p336_p0 }
  0xd8   :  { %v308_v18 = vpop.f32.mrb[0].mxu0  ;;  %v320_v19 = vpop.f32.mrb[0].mxu1 }
  0xd9   :  { %v164_v20 = vadd.f32 %v308_v18, %v269_v17  ;;  %v204_v21 = vadd.f32 %v320_v19, %v269_v17  ;;  %v158_v22 = vpop.f32.mrb[1].mxu0  ;;  %v198_v23 = vpop.f32.mrb[1].mxu1 }
  0xda   :  { %v159_v24 = vadd.f32 %v269_v17, %v158_v22  ;;  %v199_v25 = vadd.f32 %v269_v17, %v198_v23 }
  0xdb   :  { %238 = vst [vmem:[#allocation2 + $0x8] sm:$0xff] %v164_v20  ;;  %246 = vst [vmem:[#allocation2 + $0x48] sm:$0xff] %v204_v21 }
  0xdc   :  { %237 = vst [vmem:[#allocation2] sm:$0xff] %v159_v24  ;;  %245 = vst [vmem:[#allocation2 + $0x40] sm:$0xff] %v199_v25  ;;  %v311_v26 = vpop.f32.mrb[2].mxu0  ;;  %v323_v27 = vpop.f32.mrb[2].mxu1 }
  0xdd   :  { %v174_v28 = vadd.f32 %v311_v26, %v269_v17  ;;  %v214_v29 = vadd.f32 %v323_v27, %v269_v17  ;;  %v168_v30 = vpop.f32.mrb[3].mxu0  ;;  %v208_v31 = vpop.f32.mrb[3].mxu1 }
  0xde   :  { %v169_v32 = vadd.f32 %v269_v17, %v168_v30  ;;  %v209_v33 = vadd.f32 %v269_v17, %v208_v31 }
  0xdf   :  { %240 = vst [vmem:[#allocation2 + $0x18] sm:$0xff] %v174_v28  ;;  %248 = vst [vmem:[#allocation2 + $0x58] sm:$0xff] %v214_v29 }
  0xe0   :  { %239 = vst [vmem:[#allocation2 + $0x10] sm:$0xff] %v169_v32  ;;  %247 = vst [vmem:[#allocation2 + $0x50] sm:$0xff] %v209_v33  ;;  %v314_v34 = vpop.f32.mrb[4].mxu0  ;;  %v326_v35 = vpop.f32.mrb[4].mxu1 }
  0xe1   :  { %v184_v36 = vadd.f32 %v314_v34, %v269_v17  ;;  %v224_v37 = vadd.f32 %v326_v35, %v269_v17  ;;  %v178_v38 = vpop.f32.mrb[5].mxu0  ;;  %v218_v39 = vpop.f32.mrb[5].mxu1 }
  0xe2   :  { %v179_v40 = vadd.f32 %v269_v17, %v178_v38  ;;  %v219_v41 = vadd.f32 %v269_v17, %v218_v39 }
  0xe3   :  { %242 = vst [vmem:[#allocation2 + $0x28] sm:$0xff] %v184_v36  ;;  %250 = vst [vmem:[#allocation2 + $0x68] sm:$0xff] %v224_v37 }
  0xe4   :  { %241 = vst [vmem:[#allocation2 + $0x20] sm:$0xff] %v179_v40  ;;  %249 = vst [vmem:[#allocation2 + $0x60] sm:$0xff] %v219_v41  ;;  %v317_v42 = vpop.f32.mrb[6].mxu0  ;;  %v329_v43 = vpop.f32.mrb[6].mxu1 }
  0xe5   :  { %v194_v44 = vadd.f32 %v317_v42, %v269_v17  ;;  %v234_v45 = vadd.f32 %v329_v43, %v269_v17  ;;  %v188_v46 = vpop.f32.mrb[7].mxu0  ;;  %v228_v47 = vpop.f32.mrb[7].mxu1 }
  0xe6   :  { %v189_v48 = vadd.f32 %v269_v17, %v188_v46  ;;  %v229_v49 = vadd.f32 %v269_v17, %v228_v47 }
  0xe7   :  { %244 = vst [vmem:[#allocation2 + $0x38] sm:$0xff] %v194_v44  ;;  %252 = vst [vmem:[#allocation2 + $0x78] sm:$0xff] %v234_v45 }
  0xe8   :  { %243 = vst [vmem:[#allocation2 + $0x30] sm:$0xff] %v189_v48  ;;  %251 = vst [vmem:[#allocation2 + $0x70] sm:$0xff] %v229_v49 }
  0xe9   :  { %346 = shalt.err (!%p343_p4)
}
  0xea   :  { %s347_s22 = scalar_lea.hbm %s467_s3, 2048 }
  0xeb   :  { %p348_p5 = scmp.ne.s32.totalorder %s467_s3, %s347_s22  ;;  %p351_p6 = scmp.lt.u32.totalorder %s347_s22, %s467_s3 }
  0xed   :  { %p353_p7 = pnand %p351_p6, %p348_p5 }
  0xef   :  { %356 = shalt.err (!%p353_p7)
}
  0xf0   :  { %s360_s27 = smov 128   ;;  %s361_s28 = smov 8  }
  0xf1   :  { %264 = dma.vmem_to_hbm [thread:$0]  %s259_s2, 2048, %s467_s3, [#allocation3], %s360_s27, %s360_s27, %s361_s28  }
  0xf2   :  { %357 = dma.done.wait [#allocation3], 2048  }
  0xf3   :  { %358 = vsyncadd [#allocation3], 4294965248 }
  0xf4   :  { %268 = vsyncpa [#allocation3], 1 }

</bundles_post_ra>
